<compile_context>
chip_gen: v6e
topology: v6e:2x2x1
jax: 0.10.0
libtpu: 0.0.40
codegen_flags: <defaults>
</compile_context>

<pallas_src>
import functools

import jax
import jax.numpy as jnp
from jax.experimental import pallas as pl
from jax.experimental.pallas import tpu as pltpu


def _cdiv(a, b):
    return (a + b - 1) // b


def _round_up(x, m):
    return _cdiv(x, m) * m


def _ranknet_pairs_kernel(n_layers, *refs):
    # refs = (x1_tile, x2_tile, wT_1, b_1, ..., wT_{L-1}, b_{L-1},
    #         w_head_col, b_head, out_tile)
    x1_ref, x2_ref = refs[0], refs[1]
    wb = refs[2:-1]
    out_ref = refs[-1]
    act_dtype = x1_ref.dtype

    def score(h):
        # h: (feat_in, tile) with the batch tile on the 128-lane axis.
        for li in range(n_layers - 1):
            w_t = wb[2 * li][...]                       # (out, in)   act dtype
            b = wb[2 * li + 1][...]                     # (out, 1)    f32
            z = jnp.dot(w_t, h, preferred_element_type=jnp.float32) + b
            h = jnp.maximum(z, 0.0).astype(act_dtype)   # ReLU, back to act dtype
        # Final Linear(feat_last, 1) on VPU + XLU (8-sublane reduce), not MXU.
        w_col = wb[2 * (n_layers - 1)][...]             # (feat_last, 1) f32
        b_head = wb[2 * (n_layers - 1) + 1][...]        # (1, 1)         f32
        z = jnp.sum(h.astype(jnp.float32) * w_col, axis=0, keepdims=True) + b_head
        return jnp.clip(z, 0.0, 6.0)                    # nn.ReLU6 -> (1, tile)

    s1 = score(x1_ref[...])
    s2 = score(x2_ref[...])
    out_ref[...] = jax.nn.sigmoid(s1 - s2)              # lane-dense (1, tile)


def ranknet_pairs_forward(x1, x2, params, *, tb=4096, compute_dtype=jnp.bfloat16):
    """params: list of (W, b) with W shape (in, out), b shape (out,)."""
    n_layers = len(params)
    batch, feat = x1.shape
    lane = 128

    # Lane tile: multiple of 128, adapted to the batch so padding waste stays
    # bounded; use >= 2 tiles when the batch allows so v7x uses both TCs.
    tb_req = max(lane, _round_up(int(tb), lane))
    n_tiles = _cdiv(batch, tb_req)
    if _round_up(batch, lane) >= 2 * lane:
        n_tiles = max(n_tiles, 2)
    tile = _round_up(_cdiv(batch, n_tiles), lane)
    padded = n_tiles * tile

    # Layout plumbing, fused into one XLA pass per input:
    # cast -> transpose (batch onto lanes) -> pad to the tile grid.
    def prep(x):
        xt = jnp.transpose(x.astype(compute_dtype))      # (feat, batch)
        return jnp.pad(xt, ((0, 0), (0, padded - batch)))

    x1_t = prep(x1)
    x2_t = prep(x2)

    # Weights: hidden layers transposed to (out, in) in the compute dtype; the
    # final (feat_last, 1) column and all biases stay f32 (column-shaped so
    # they broadcast over the lane axis).
    flat = []
    for li, (w, b) in enumerate(params):
        if li == n_layers - 1:
            flat.append(w.astype(jnp.float32))                       # (feat_last, 1)
            flat.append(b.reshape(1, 1).astype(jnp.float32))         # (1, 1)
        else:
            flat.append(jnp.transpose(w).astype(compute_dtype))      # (out, in)
            flat.append(b.reshape(-1, 1).astype(jnp.float32))        # (out, 1)

    in_specs = [
        pl.BlockSpec((feat, tile), lambda i: (0, i)),    # x1 tile (lanes = batch)
        pl.BlockSpec((feat, tile), lambda i: (0, i)),    # x2 tile
    ]
    # Weights / biases: whole array, constant block index -> resident in VMEM.
    for arr in flat:
        in_specs.append(pl.BlockSpec(arr.shape, lambda i: (0, 0)))

    act_bytes = jnp.dtype(compute_dtype).itemsize
    param_bytes = sum(int(a.size) * a.dtype.itemsize for a in flat)
    layer_flops = sum(2 * w.shape[0] * w.shape[1] for (w, _) in params)
    cost = pl.CostEstimate(
        flops=int(2 * padded * layer_flops),             # x1 + x2 streams
        transcendentals=int(padded),                     # sigmoid
        bytes_accessed=int(2 * padded * feat * act_bytes + padded * 4 + param_bytes),
    )

    kernel = functools.partial(_ranknet_pairs_kernel, n_layers)
    out = pl.pallas_call(
        kernel,
        out_shape=jax.ShapeDtypeStruct((1, padded), jnp.float32),
        grid_spec=pltpu.PrefetchScalarGridSpec(
            num_scalar_prefetch=0,
            grid=(n_tiles,),
            in_specs=in_specs,
            out_specs=pl.BlockSpec((1, tile), lambda i: (0, i)),
        ),
        compiler_params=pltpu.CompilerParams(
            dimension_semantics=("parallel",),
        ),
        cost_estimate=cost,
    )(x1_t, x2_t, *flat)

    return out[0, :batch].reshape(batch, 1)


def init_params(key, net_structures):
    """Deterministic init mimicking nn.Linear default (uniform +-1/sqrt(fan_in)).

    RankNet builds len(net_structures)-1 hidden Linear layers plus a final
    Linear(net_structures[-1], 1).
    """
    dims = list(net_structures) + [1]
    params = []
    for i in range(len(dims) - 1):
        fan_in, fan_out = dims[i], dims[i + 1]
        key, kw, kb = jax.random.split(key, 3)
        bound = 1.0 / (fan_in ** 0.5)
        w = jax.random.uniform(
            kw, (fan_in, fan_out), jnp.float32, minval=-bound, maxval=bound
        )
        b = jax.random.uniform(
            kb, (fan_out,), jnp.float32, minval=-bound, maxval=bound
        )
        params.append((w, b))
    return params


def reference_forward(x1, x2, params):
    """Pure-JAX f32 reference matching the PyTorch RankNetPairs.forward."""
    h1, h2 = x1, x2
    n = len(params)
    for li, (w, b) in enumerate(params):
        z1 = h1 @ w + b
        z2 = h2 @ w + b
        if li < n - 1:
            h1, h2 = jnp.maximum(z1, 0.0), jnp.maximum(z2, 0.0)
        else:
            h1, h2 = jnp.clip(z1, 0.0, 6.0), jnp.clip(z2, 0.0, 6.0)
    return jax.nn.sigmoid(h1 - h2)


if __name__ == "__main__":
    net_structures = [32, 16, 8]   # fc1: 32->16, fc2: 16->8, fc3: 8->1

    key = jax.random.PRNGKey(0)
    key, kp = jax.random.split(key)
    params = init_params(kp, net_structures)

    # 1) f32 path, single tile: exact numerical check.
    key, k1, k2 = jax.random.split(key, 3)
    x1 = jax.random.normal(k1, (8, net_structures[0]), jnp.float32)
    x2 = jax.random.normal(k2, (8, net_structures[0]), jnp.float32)
    out = jax.block_until_ready(
        ranknet_pairs_forward(x1, x2, params, compute_dtype=jnp.float32))
    ref = reference_forward(x1, x2, params)
    assert out.shape == (8, 1), out.shape
    assert jnp.allclose(out, ref, atol=1e-5, rtol=1e-5), (out, ref)

    # 2) Default bf16 path, multi-tile grid, ragged batch (padding sliced off).
    key, k3, k4 = jax.random.split(key, 3)
    x1b = jax.random.normal(k3, (300, net_structures[0]), jnp.float32)
    x2b = jax.random.normal(k4, (300, net_structures[0]), jnp.float32)
    outb = jax.block_until_ready(ranknet_pairs_forward(x1b, x2b, params, tb=128))
    refb = reference_forward(x1b, x2b, params)
    assert outb.shape == (300, 1), outb.shape
    # bf16 activations/weights: sigmoid outputs agree to ~1e-2.
    assert jnp.allclose(outb, refb, atol=3e-2), float(jnp.max(jnp.abs(outb - refb)))

    print("KERNEL_OK")
</pallas_src>

<mosaic_0001>
module attributes {stable_mosaic.version = 11 : i64} {
  func.func @_ranknet_pairs_kernel(%arg0: i32, %arg1: memref<32x128xf32, #tpu.memory_space<vmem>>, %arg2: memref<32x128xf32, #tpu.memory_space<vmem>>, %arg3: memref<16x32xf32, #tpu.memory_space<vmem>>, %arg4: memref<16x1xf32, #tpu.memory_space<vmem>>, %arg5: memref<8x16xf32, #tpu.memory_space<vmem>>, %arg6: memref<8x1xf32, #tpu.memory_space<vmem>>, %arg7: memref<8x1xf32, #tpu.memory_space<vmem>>, %arg8: memref<1x1xf32, #tpu.memory_space<vmem>>, %arg9: memref<1x128xf32, #tpu.memory_space<vmem>>) attributes {dimension_semantics = [#tpu.dimension_semantics<parallel>], iteration_bounds = array<i64: 1>, scalar_prefetch = 0 : i64, scratch_operands = 0 : i64, tpu.core_type = #tpu.core_type<tc>, window_params = [{transform_indices = @transform_0, window_bounds = array<i64: 32, 128>}, {transform_indices = @transform_1, window_bounds = array<i64: 32, 128>}, {pipeline_mode = #tpu.pipeline_mode<synchronous>, transform_indices = @transform_2, window_bounds = array<i64: 16, 32>}, {pipeline_mode = #tpu.pipeline_mode<synchronous>, transform_indices = @transform_3, window_bounds = array<i64: 16, 1>}, {pipeline_mode = #tpu.pipeline_mode<synchronous>, transform_indices = @transform_4, window_bounds = array<i64: 8, 16>}, {pipeline_mode = #tpu.pipeline_mode<synchronous>, transform_indices = @transform_5, window_bounds = array<i64: 8, 1>}, {pipeline_mode = #tpu.pipeline_mode<synchronous>, transform_indices = @transform_6, window_bounds = array<i64: 8, 1>}, {pipeline_mode = #tpu.pipeline_mode<synchronous>, transform_indices = @transform_7, window_bounds = array<i64: 1, 1>}, {transform_indices = @transform_8, window_bounds = array<i64: 1, 128>}]} {
    %c0 = arith.constant 0 : index
    %c0_0 = arith.constant 0 : index
    %0 = vector.load %arg1[%c0, %c0_0] : memref<32x128xf32, #tpu.memory_space<vmem>>, vector<32x128xf32>
    %c0_1 = arith.constant 0 : index
    %c0_2 = arith.constant 0 : index
    %1 = vector.load %arg3[%c0_1, %c0_2] : memref<16x32xf32, #tpu.memory_space<vmem>>, vector<16x32xf32>
    %c0_3 = arith.constant 0 : index
    %c0_4 = arith.constant 0 : index
    %2 = vector.load %arg4[%c0_3, %c0_4] : memref<16x1xf32, #tpu.memory_space<vmem>>, vector<16x1xf32>
    %cst = arith.constant dense<0.000000e+00> : vector<16x128xf32>
    %3 = tpu.matmul %1, %0, %cst {dimension_numbers = #tpu.dot_dimension_numbers<[1], [0], [0], [1], [0, 0, 1, 1], [], []>} : vector<16x32xf32>, vector<32x128xf32>, vector<16x128xf32> -> vector<16x128xf32>
    %4 = vector.broadcast %2 : vector<16x1xf32> to vector<16x128xf32>
    %5 = arith.addf %3, %4 : vector<16x128xf32>
    %cst_5 = arith.constant 0.000000e+00 : f32
    %6 = vector.broadcast %cst_5 : f32 to vector<16x128xf32>
    %7 = arith.maximumf %5, %6 : vector<16x128xf32>
    %c0_6 = arith.constant 0 : index
    %c0_7 = arith.constant 0 : index
    %8 = vector.load %arg5[%c0_6, %c0_7] : memref<8x16xf32, #tpu.memory_space<vmem>>, vector<8x16xf32>
    %c0_8 = arith.constant 0 : index
    %c0_9 = arith.constant 0 : index
    %9 = vector.load %arg6[%c0_8, %c0_9] : memref<8x1xf32, #tpu.memory_space<vmem>>, vector<8x1xf32>
    %cst_10 = arith.constant dense<0.000000e+00> : vector<8x128xf32>
    %10 = tpu.matmul %8, %7, %cst_10 {dimension_numbers = #tpu.dot_dimension_numbers<[1], [0], [0], [1], [0, 0, 1, 1], [], []>} : vector<8x16xf32>, vector<16x128xf32>, vector<8x128xf32> -> vector<8x128xf32>
    %11 = vector.broadcast %9 : vector<8x1xf32> to vector<8x128xf32>
    %12 = arith.addf %10, %11 : vector<8x128xf32>
    %cst_11 = arith.constant 0.000000e+00 : f32
    %13 = vector.broadcast %cst_11 : f32 to vector<8x128xf32>
    %14 = arith.maximumf %12, %13 : vector<8x128xf32>
    %c0_12 = arith.constant 0 : index
    %c0_13 = arith.constant 0 : index
    %15 = vector.load %arg7[%c0_12, %c0_13] : memref<8x1xf32, #tpu.memory_space<vmem>>, vector<8x1xf32>
    %c0_14 = arith.constant 0 : index
    %c0_15 = arith.constant 0 : index
    %16 = vector.load %arg8[%c0_14, %c0_15] : memref<1x1xf32, #tpu.memory_space<vmem>>, vector<1x1xf32>
    %17 = vector.broadcast %15 : vector<8x1xf32> to vector<8x128xf32>
    %18 = arith.mulf %14, %17 : vector<8x128xf32>
    %cst_16 = arith.constant dense<0.000000e+00> : vector<128xf32>
    %19 = vector.multi_reduction <add>, %18, %cst_16 [0] : vector<8x128xf32> to vector<128xf32>
    %20 = vector.shape_cast %19 : vector<128xf32> to vector<1x128xf32>
    %21 = vector.broadcast %16 : vector<1x1xf32> to vector<1x128xf32>
    %22 = arith.addf %20, %21 : vector<1x128xf32>
    %cst_17 = arith.constant 0.000000e+00 : f32
    %cst_18 = arith.constant 6.000000e+00 : f32
    %23 = vector.broadcast %cst_17 : f32 to vector<1x128xf32>
    %24 = arith.maximumf %23, %22 : vector<1x128xf32>
    %25 = vector.broadcast %cst_18 : f32 to vector<1x128xf32>
    %26 = arith.minimumf %25, %24 : vector<1x128xf32>
    %c0_19 = arith.constant 0 : index
    %c0_20 = arith.constant 0 : index
    %27 = vector.load %arg2[%c0_19, %c0_20] : memref<32x128xf32, #tpu.memory_space<vmem>>, vector<32x128xf32>
    %c0_21 = arith.constant 0 : index
    %c0_22 = arith.constant 0 : index
    %28 = vector.load %arg3[%c0_21, %c0_22] : memref<16x32xf32, #tpu.memory_space<vmem>>, vector<16x32xf32>
    %c0_23 = arith.constant 0 : index
    %c0_24 = arith.constant 0 : index
    %29 = vector.load %arg4[%c0_23, %c0_24] : memref<16x1xf32, #tpu.memory_space<vmem>>, vector<16x1xf32>
    %cst_25 = arith.constant dense<0.000000e+00> : vector<16x128xf32>
    %30 = tpu.matmul %28, %27, %cst_25 {dimension_numbers = #tpu.dot_dimension_numbers<[1], [0], [0], [1], [0, 0, 1, 1], [], []>} : vector<16x32xf32>, vector<32x128xf32>, vector<16x128xf32> -> vector<16x128xf32>
    %31 = vector.broadcast %29 : vector<16x1xf32> to vector<16x128xf32>
    %32 = arith.addf %30, %31 : vector<16x128xf32>
    %cst_26 = arith.constant 0.000000e+00 : f32
    %33 = vector.broadcast %cst_26 : f32 to vector<16x128xf32>
    %34 = arith.maximumf %32, %33 : vector<16x128xf32>
    %c0_27 = arith.constant 0 : index
    %c0_28 = arith.constant 0 : index
    %35 = vector.load %arg5[%c0_27, %c0_28] : memref<8x16xf32, #tpu.memory_space<vmem>>, vector<8x16xf32>
    %c0_29 = arith.constant 0 : index
    %c0_30 = arith.constant 0 : index
    %36 = vector.load %arg6[%c0_29, %c0_30] : memref<8x1xf32, #tpu.memory_space<vmem>>, vector<8x1xf32>
    %cst_31 = arith.constant dense<0.000000e+00> : vector<8x128xf32>
    %37 = tpu.matmul %35, %34, %cst_31 {dimension_numbers = #tpu.dot_dimension_numbers<[1], [0], [0], [1], [0, 0, 1, 1], [], []>} : vector<8x16xf32>, vector<16x128xf32>, vector<8x128xf32> -> vector<8x128xf32>
    %38 = vector.broadcast %36 : vector<8x1xf32> to vector<8x128xf32>
    %39 = arith.addf %37, %38 : vector<8x128xf32>
    %cst_32 = arith.constant 0.000000e+00 : f32
    %40 = vector.broadcast %cst_32 : f32 to vector<8x128xf32>
    %41 = arith.maximumf %39, %40 : vector<8x128xf32>
    %c0_33 = arith.constant 0 : index
    %c0_34 = arith.constant 0 : index
    %42 = vector.load %arg7[%c0_33, %c0_34] : memref<8x1xf32, #tpu.memory_space<vmem>>, vector<8x1xf32>
    %c0_35 = arith.constant 0 : index
    %c0_36 = arith.constant 0 : index
    %43 = vector.load %arg8[%c0_35, %c0_36] : memref<1x1xf32, #tpu.memory_space<vmem>>, vector<1x1xf32>
    %44 = vector.broadcast %42 : vector<8x1xf32> to vector<8x128xf32>
    %45 = arith.mulf %41, %44 : vector<8x128xf32>
    %cst_37 = arith.constant dense<0.000000e+00> : vector<128xf32>
    %46 = vector.multi_reduction <add>, %45, %cst_37 [0] : vector<8x128xf32> to vector<128xf32>
    %47 = vector.shape_cast %46 : vector<128xf32> to vector<1x128xf32>
    %48 = vector.broadcast %43 : vector<1x1xf32> to vector<1x128xf32>
    %49 = arith.addf %47, %48 : vector<1x128xf32>
    %cst_38 = arith.constant 0.000000e+00 : f32
    %cst_39 = arith.constant 6.000000e+00 : f32
    %50 = vector.broadcast %cst_38 : f32 to vector<1x128xf32>
    %51 = arith.maximumf %50, %49 : vector<1x128xf32>
    %52 = vector.broadcast %cst_39 : f32 to vector<1x128xf32>
    %53 = arith.minimumf %52, %51 : vector<1x128xf32>
    %54 = arith.subf %26, %53 : vector<1x128xf32>
    %55 = arith.negf %54 : vector<1x128xf32>
    %56 = math.exp %55 : vector<1x128xf32>
    %cst_40 = arith.constant 1.000000e+00 : f32
    %57 = vector.broadcast %cst_40 : f32 to vector<1x128xf32>
    %58 = arith.addf %57, %56 : vector<1x128xf32>
    %59 = arith.divf %57, %58 : vector<1x128xf32>
    %c0_41 = arith.constant 0 : index
    %c0_42 = arith.constant 0 : index
    %60 = vector.load %arg9[%c0_41, %c0_42] : memref<1x128xf32, #tpu.memory_space<vmem>>, vector<1x128xf32>
    tpu.vector_store %arg9[%c0_41, %c0_42], %59 {strides = array<i32>} : memref<1x128xf32, #tpu.memory_space<vmem>>, vector<1x128xf32>,
    return
  }
  func.func @transform_0(%arg0: i32) -> (i32, i32) {
    %c0_i32 = arith.constant 0 : i32
    %c0_i32_0 = arith.constant 0 : i32
    return %c0_i32, %arg0 : i32, i32
  }
  func.func @transform_1(%arg0: i32) -> (i32, i32) {
    %c0_i32 = arith.constant 0 : i32
    %c0_i32_0 = arith.constant 0 : i32
    return %c0_i32, %arg0 : i32, i32
  }
  func.func @transform_2(%arg0: i32) -> (i32, i32) {
    %c0_i32 = arith.constant 0 : i32
    %c0_i32_0 = arith.constant 0 : i32
    %c0_i32_1 = arith.constant 0 : i32
    return %c0_i32, %c0_i32_0 : i32, i32
  }
  func.func @transform_3(%arg0: i32) -> (i32, i32) {
    %c0_i32 = arith.constant 0 : i32
    %c0_i32_0 = arith.constant 0 : i32
    %c0_i32_1 = arith.constant 0 : i32
    return %c0_i32, %c0_i32_0 : i32, i32
  }
  func.func @transform_4(%arg0: i32) -> (i32, i32) {
    %c0_i32 = arith.constant 0 : i32
    %c0_i32_0 = arith.constant 0 : i32
    %c0_i32_1 = arith.constant 0 : i32
    return %c0_i32, %c0_i32_0 : i32, i32
  }
  func.func @transform_5(%arg0: i32) -> (i32, i32) {
    %c0_i32 = arith.constant 0 : i32
    %c0_i32_0 = arith.constant 0 : i32
    %c0_i32_1 = arith.constant 0 : i32
    return %c0_i32, %c0_i32_0 : i32, i32
  }
  func.func @transform_6(%arg0: i32) -> (i32, i32) {
    %c0_i32 = arith.constant 0 : i32
    %c0_i32_0 = arith.constant 0 : i32
    %c0_i32_1 = arith.constant 0 : i32
    return %c0_i32, %c0_i32_0 : i32, i32
  }
  func.func @transform_7(%arg0: i32) -> (i32, i32) {
    %c0_i32 = arith.constant 0 : i32
    %c0_i32_0 = arith.constant 0 : i32
    %c0_i32_1 = arith.constant 0 : i32
    return %c0_i32, %c0_i32_0 : i32, i32
  }
  func.func @transform_8(%arg0: i32) -> (i32, i32) {
    %c0_i32 = arith.constant 0 : i32
    %c0_i32_0 = arith.constant 0 : i32
    return %c0_i32, %arg0 : i32, i32
  }
}

</mosaic_0001>

<bundles_post_ra>
// kernel: tpu_custom_call.1
= control target key start
LH: loop header
LB: loop body
LE: loop exit
PB: predicated region body
PF: predicated region fallthrough
CT: control target
= control target key end

     0   :  { %s695_s0 = inlined_call_operand.vmem [shape: f32[32,128], index: 0, kind: input, shape index: {}]   ;;  %s696_s1 = inlined_call_operand.hbm [shape: f32[32,128], index: 1, kind: input, shape index: {}]   ;;  %s697_s2 = inlined_call_operand.hbm [shape: f32[16,32], index: 2, kind: input, shape index: {}]   ;;  %s698_s3 = inlined_call_operand.vmem [shape: f32[16,1], index: 3, kind: input, shape index: {}]   ;;  %s699_s4 = inlined_call_operand.vmem [shape: f32[8,16], index: 4, kind: input, shape index: {}]   ;;  %s700_s5 = inlined_call_operand.vmem [shape: f32[8,1], index: 5, kind: input, shape index: {}]   ;;  %s701_s6 = inlined_call_operand.vmem [shape: f32[8,1], index: 6, kind: input, shape index: {}]   ;;  %s702_s7 = inlined_call_operand.<no memory space> [shape: f32[1,1], index: 7, kind: input, shape index: {}]   ;;  %s703_s8 = inlined_call_operand.hbm [shape: f32[1,128], index: 8, kind: output, shape index: {}]  }
   0x1   :  { %v13_v0 = vstv %s702_s7 }
   0x2   :  { %14 = vst [vmem:[#allocation2] sm:$0x1] %v13_v0 }
   0x3   :  { %15 = vsyncpa [#allocation4], 0 }
   0x4   :  { %16 = vsyncpa [#allocation7], 0 }
   0x5   :  { %17 = vsyncpa [#allocation5], 0  ;;  %s597_s29 = smov [#allocation3]  }
   0x6   :  { %s25_s30 = sshll.u32 %s597_s29, 4  ;;  %s26_s30 = int_to_ptr.vmem [resolvable:$true] %s25_s30 }
   0x7   :  { %s539_s9 = scalar_lea.vmem %s26_s30, 512  ;;  %p544_p1 = scmp.lt.s32.totalorder %s26_s30, %s26_s30 }
   0x8   :  { %p540_p0 = scmp.ne.s32.totalorder %s26_s30, %s539_s9  ;;  %p545_p2 = scmp.lt.s32.totalorder %s539_s9, %s539_s9 }
   0xa   :  { %p546_p3 = por %p545_p2, %p544_p1 }
   0xc   :  { %p547_p4 = pnand %p546_p3, %p540_p0 }
   0xe   :  { %550 = shalt.err (!%p547_p4)
}
   0xf   :  { %s598_s10 = smov 128   ;;  %s599_s11 = smov 8  }
  0x10   :  { %31 = dma.hbm_to_vmem [thread:$0]  %s696_s1, 512, %s26_s30, [#allocation4], %s598_s10, %s598_s10, %s599_s11  }
  0x11   :  { %s600_s7 = smov [#allocation6]  }
  0x12   :  { %s37_s14 = sshll.u32 %s600_s7, 4  ;;  %s38_s14 = int_to_ptr.vmem [resolvable:$true] %s37_s14 }
  0x13   :  { %s559_s15 = scalar_lea.vmem %s38_s14, 256  ;;  %p564_p6 = scmp.lt.s32.totalorder %s38_s14, %s38_s14 }
  0x14   :  { %p560_p5 = scmp.ne.s32.totalorder %s38_s14, %s559_s15  ;;  %p565_p7 = scmp.lt.s32.totalorder %s559_s15, %s559_s15 }
  0x16   :  { %p566_p8 = por %p565_p7, %p564_p6 }
  0x18   :  { %p567_p9 = pnand %p566_p8, %p560_p5 }
  0x1a   :  { %570 = shalt.err (!%p567_p9)
}
  0x1b   :  { %43 = dma.hbm_to_vmem [thread:$0]  %s697_s2, 256, %s38_s14, [#allocation7], %s598_s10, %s598_s10, %s599_s11  }
  0x1c   :  { %591 = dma.done.wait [#allocation4], 512  }
  0x1d   :  { %592 = vsyncadd [#allocation4], 4294966784 }
  0x1e   :  { %593 = dma.done.wait [#allocation7], 256  }
  0x1f   :  { %594 = vsyncadd [#allocation7], 4294967040  ;;  %v601_v1 = vmov 0   ;;  %vm78_vm0 = vcmask 261120   ;;  %v63_v2 = vld [vmem:[%s695_s0 + $0x18] sm:$0xff]  ;;  %v62_v3 = vld [vmem:[%s695_s0 + $0x10] sm:$0xff]  ;;  %v263_v44 = vlaneseq }
  0x20   :  { %525 = vset.pattern.permute.xlu0 %v601_v1  ;;  %526 = vset.pattern.permute.xlu1 %v601_v1  ;;  %v64_v4 = vld [vmem:[#allocation6] sm:$0xff]  ;;  %v65_v9 = vld [vmem:[#allocation6 + $0x8] sm:$0xff]  ;;  %v245_v10 = vld [vmem:[#allocation2] sm:$0x1]  ;;  %v602_v11 = vmov 0.0   ;;  %vm603_vm1 = vmmov 0  }
  0x21   :  { %481 = vmatprep.subr.mxu0 %v63_v2  ;;  %v61_v5 = vld [vmem:[%s695_s0 + $0x8] sm:$0xff]  ;;  %489 = vmatprep.mubr.msk.f32.mxu0 %vm78_vm0, %v64_v4  ;;  %v60_v7 = vld [vmem:[%s695_s0] sm:$0xff]  ;;  %vm169_vm2 = vcmask 130048   ;;  %v272_v24 = vld [vmem:[#allocation3 + $0x10] sm:$0xff]  ;;  %v264_v49 = vshrl.u32 %v263_v44, 7 }
  0x22   :  { %482 = vmatpush3.msra.mxu0 %v63_v2  ;;  %v67_v6 = vld [vmem:[%s698_s3 + $0x8] sm:$0xff]  ;;  %v66_v8 = vld [vmem:[%s698_s3] sm:$0xff]  ;;  %492 = vmatprep.subr.mxu1 %v602_v11 }
  0x23   :  { %483 = vmatprep.subr.mxu0 %v62_v3  ;;  %75 = vperm.xlu0 %525, %v67_v6   ;;  %v163_v12 = vld [vmem:[%s700_s5] sm:$0xff]  ;;  %v271_v25 = vld [vmem:[#allocation3 + $0x8] sm:$0xff]  ;;  %v265_v53 = vsub.s32 0, %v264_v49 }
  0x24   :  { %484 = vmatpush3.msra.mxu0 %v62_v3  ;;  %496 = vmatprep.mubr.msk.f32.mxu1 %vm603_vm1, %v602_v11  ;;  %v244_v13 = vld [vmem:[%s701_s6] sm:$0xff] }
  0x25   :  { %485 = vmatprep.subr.mxu0 %v61_v5  ;;  %166 = vperm.xlu1 %526, %v163_v12   ;;  %v162_v22 = vld [vmem:[%s699_s4] sm:$0xff]  ;;  %s604_s4 = smov [#allocation8]  }
  0x26   :  { %486 = vmatpush3.msra.mxu0 %v61_v5  ;;  %v273_v23 = vld [vmem:[#allocation3 + $0x18] sm:$0xff]  ;;  %v270_v26 = vld [vmem:[#allocation3] sm:$0xff]  ;;  %s446_s5 = sshll.u32 %s604_s4, 4  ;;  %s447_s5 = int_to_ptr.vmem [resolvable:$true] %s446_s5 }
  0x27   :  { %487 = vmatprep.subr.mxu0 %v60_v7  ;;  %70 = vperm.xlu0 %525, %v66_v8   ;;  %s571_s6 = scalar_lea.vmem %s447_s5, 16  ;;  %s575_s10 = scalar_lea.vmem %s447_s5, 32 }
  0x28   :  { %488 = vmatpush3.msra.mxu0 %v60_v7  ;;  %p572_p10 = scmp.ne.s32.totalorder %s447_s5, %s571_s6  ;;  %p576_p11 = scmp.lt.s32.totalorder %s447_s5, %s447_s5 }
  0x29   :  { %490 = vmatmul.mubr.msk.f32.vlgmr.msra.gmra.mxu0 %vm78_vm0, %v65_v9  ;;  %510 = vmatprep.subr.mxu0 %v602_v11  ;;  %p577_p12 = scmp.lt.s32.totalorder %s575_s10, %s571_s6 }
  0x2a   :  { %514 = vmatprep.mubr.msk.f32.mxu0 %vm603_vm1, %v602_v11  ;;  %248 = vperm.xlu1 %526, %v244_v13  }
  0x2b   :  { %260 = vperm.xlu0 %525, %v245_v10   ;;  %p578_p13 = por %p577_p12, %p576_p11 }
  0x2d   :  { %p579_p0 = pnand %p578_p13, %p572_p10 }
  0x9e   :  { %v76_v14 = vpop.permute.xlu0 %75 }
  0xa0   :  { %v167_v35 = vpop.permute.xlu1 %166 }
  0xa2   :  { %v71_v17 = vpop.permute.xlu0 %70 }
  0xa5   :  { %v249_v38 = vpop.permute.xlu1 %248 }
  0xa6   :  { %v261_v55 = vpop.permute.xlu0 %260 }
  0xa7   :  { %v266_v58 = vrot.slane %v261_v55, %v265_v53 }
  0xe9   :  { %v491_v15 = vpop.f32.mrf.mxu0 }
  0xea   :  { %v157_v16 = vadd.f32 %v491_v15, %v76_v14 }
  0xeb   :  { %v151_v18 = vpop.f32.mrf.mxu0 }
  0xec   :  { %v161_v19 = vmax.f32 %v157_v16, 0.0  ;;  %v152_v20 = vadd.f32 %v151_v18, %v71_v17 }
  0xee   :  { %v160_v21 = vmax.f32 %v152_v20, 0.0  ;;  %493 = vmatpush3.msra.mxu1 %v161_v19 }
  0xef   :  { %494 = vmatprep.subr.mxu1 %v602_v11 }
  0xf0   :  { %495 = vmatpush3.msra.mxu1 %v160_v21 }
  0xf1   :  { %497 = vmatmul.mubr.msk.f32.vlgmr.msra.gmra.mxu1 %vm169_vm2, %v162_v22  ;;  %499 = vmatprep.subr.mxu1 %v273_v23 }
  0xf2   :  { %500 = vmatpush3.msra.mxu1 %v273_v23  ;;  %507 = vmatprep.mubr.msk.f32.mxu1 %vm78_vm0, %v64_v4 }
  0xf3   :  { %501 = vmatprep.subr.mxu1 %v272_v24 }
  0xf4   :  { %502 = vmatpush3.msra.mxu1 %v272_v24 }
  0xf5   :  { %503 = vmatprep.subr.mxu1 %v271_v25 }
  0xf6   :  { %504 = vmatpush3.msra.mxu1 %v271_v25 }
  0xf7   :  { %505 = vmatprep.subr.mxu1 %v270_v26 }
  0xf8   :  { %506 = vmatpush3.msra.mxu1 %v270_v26 }
  0xf9   :  { %508 = vmatmul.mubr.msk.f32.vlgmr.msra.gmra.mxu1 %vm78_vm0, %v65_v9 }
 0x1b1   :  { %v239_v27 = vpop.f32.mrf.mxu1 }
 0x1b2   :  { %v240_v36 = vadd.f32 %v239_v27, %v167_v35 }
 0x1b3   :  { %v498_v28 = vpop.f32.mrf.mxu1 }
 0x1b4   :  { %v243_v37 = vmax.f32 %v240_v36, 0.0 }
 0x1b6   :  { %v251_v39 = vmul.f32 %v249_v38, %v243_v37 }
 0x1b8   :  { %v252_v40 = vrot.slane %v251_v39, 4 }
 0x1b9   :  { %v509_v29 = vpop.f32.mrf.mxu1 }
 0x1ba   :  { %v346_v30 = vadd.f32 %v509_v29, %v76_v14  ;;  %v253_v41 = vadd.f32 %v252_v40, %v251_v39 }
 0x1bb   :  { %v340_v31 = vpop.f32.mrf.mxu1 }
 0x1bc   :  { %v350_v32 = vmax.f32 %v346_v30, 0.0  ;;  %v341_v33 = vadd.f32 %v340_v31, %v71_v17  ;;  %v254_v42 = vrot.slane %v253_v41, 2 }
 0x1be   :  { %v349_v34 = vmax.f32 %v341_v33, 0.0  ;;  %511 = vmatpush3.msra.mxu0 %v350_v32  ;;  %v255_v47 = vadd.f32 %v254_v42, %v253_v41 }
 0x1bf   :  { %512 = vmatprep.subr.mxu0 %v602_v11 }
 0x1c0   :  { %513 = vmatpush3.msra.mxu0 %v349_v34  ;;  %v256_v51 = vrot.slane %v255_v47, 1 }
 0x1c1   :  { %515 = vmatmul.mubr.msk.f32.vlgmr.msra.gmra.mxu0 %vm169_vm2, %v162_v22 }
 0x1c2   :  { %v257_v56 = vadd.f32 %v256_v51, %v255_v47 }
 0x1c4   :  { %v267_v60 = vadd.f32 %v266_v58, %v257_v56 }
 0x1c6   :  { %v268_v63 = vmax.f32 %v267_v60, 0.0 }
 0x1c8   :  { %v269_v2 = vmin.f32 %v268_v63, 6.0 }
 0x281   :  { %v417_v43 = vpop.f32.mrf.mxu0 }
 0x282   :  { %v418_v45 = vadd.f32 %v417_v43, %v167_v35 }
 0x283   :  { %v516_v46 = vpop.f32.mrf.mxu0 }
 0x284   :  { %v421_v48 = vmax.f32 %v418_v45, 0.0 }
 0x286   :  { %v422_v50 = vmul.f32 %v421_v48, %v249_v38 }
 0x288   :  { %v423_v52 = vrot.slane %v422_v50, 4 }
 0x28a   :  { %v424_v54 = vadd.f32 %v423_v52, %v422_v50 }
 0x28c   :  { %v425_v57 = vrot.slane %v424_v54, 2 }
 0x28e   :  { %v426_v59 = vadd.f32 %v425_v57, %v424_v54 }
 0x290   :  { %v427_v61 = vrot.slane %v426_v59, 1 }
 0x292   :  { %v428_v62 = vadd.f32 %v427_v61, %v426_v59 }
 0x294   :  { %v429_v0 = vadd.f32 %v428_v62, %v266_v58 }
 0x296   :  { %v430_v1 = vmax.f32 %v429_v0, 0.0 }
 0x298   :  { %v431_v3 = vmin.f32 %v430_v1, 6.0 }
 0x29a   :  { %v432_v4 = vsub.f32 %v269_v2, %v431_v3 }
 0x29c   :  { %v462_v5 = vmul.f32 -1.442695, %v432_v4 }
 0x29e   :  { %527 = vpow2.f32 %v462_v5 }
 0x2ab   :  { %v528_v6 = vpop.eup %527 }
 0x2ac   :  { %v436_v7 = vadd.f32 1.0, %v528_v6 }
 0x2ae   :  { %529 = vrcp.f32 %v436_v7 }
 0x2bb   :  { %v530_v8 = vpop.eup %529 }
 0x2bc   :  { %439 = vst [vmem:[#allocation8] sm:$0x1] %v530_v8 }
 0x2bd   :  { %582 = shalt.err (!%p579_p0)
}
 0x2be   :  { %449 = dma.vmem_to_hbm [thread:$0]  %s447_s5, 16, %s703_s8, [#allocation5]  }
 0x2bf   :  { %595 = dma.done.wait [#allocation5], 16  }
 0x2c0   :  { %596 = vsyncadd [#allocation5], 4294967280 }
 0x2c1   :  { %453 = vsyncpa [#allocation4], 1 }
 0x2c2   :  { %454 = vsyncpa [#allocation7], 1 }
 0x2c3   :  { %455 = vsyncpa [#allocation5], 1 }

</bundles_post_ra>
